<compile_context>
chip_gen: v5e
topology: v5e:2x2
jax: 0.10.0
libtpu: 0.0.40
codegen_flags: <defaults>
</compile_context>

<pallas_src>
import jax
import jax.numpy as jnp
from jax.experimental import pallas as pl
from jax.experimental.pallas import tpu as pltpu

LANE = 128          # TPU lane width
SUBLANE_BF16 = 16   # bf16 sublane packing
_BN_EPS = 1e-5      # torch BatchNorm1d default eps


def _round_up(x, m):
    return (x + m - 1) // m * m


# ----------------------------------------------------------------------------
# Fused kernel: whole MLP in one pallas_call, static Python loop over layers.
# ----------------------------------------------------------------------------
def _make_fused_mlp_kernel(n_layers):
    def kernel(x_ref, *refs):
        out_ref = refs[-1]
        h = x_ref[...]                                    # bf16 (TILE_N, d_in_pad)
        for i in range(n_layers):
            w = refs[2 * i][...]                          # bf16 (din_pad, dout_pad)
            b = refs[2 * i + 1][...]                      # f32  (1, dout_pad)
            y = jnp.dot(h, w, preferred_element_type=jnp.float32) + b
            if i < n_layers - 1:
                # ReLU; eval-mode BN affine is folded into layer i+1's W/b.
                h = jnp.maximum(y, 0.0).astype(jnp.bfloat16)
            else:
                out_ref[...] = y.astype(out_ref.dtype)
        # TODO(synk): F.dropout(training=True) not implemented — eval-mode identity.
    return kernel


# ----------------------------------------------------------------------------
# Wrapper-side parameter prep: fold eval-mode BN into next layer, pad to lanes.
# ----------------------------------------------------------------------------
def _prepare_params(params, apply_bn):
    """Returns list of (W_bf16 [din_pad, dout_pad], b_f32 [1, dout_pad])."""
    lins = params["lins"]
    bns = params["bns"]
    n_layers = len(lins)

    folded = []
    cur_w, cur_b = lins[0]
    for i in range(n_layers - 1):
        gamma, beta, mean, var = bns[i]
        if apply_bn:
            scale = gamma * jax.lax.rsqrt(var + _BN_EPS)   # (1, d)
            shift = beta - mean * scale                    # (1, d)
        else:  # module skips BN when batch size == 1
            scale = jnp.ones_like(gamma)
            shift = jnp.zeros_like(beta)
        folded.append((cur_w, cur_b))
        w_next, b_next = lins[i + 1]
        # (relu(h)*scale + shift) @ W + b  ==  relu(h) @ (diag(scale) @ W) + (shift @ W + b)
        cur_w = w_next * scale.T                           # scale rows of W_{i+1}
        cur_b = b_next + shift @ w_next
    folded.append((cur_w, cur_b))

    out = []
    for w, b in folded:
        din, dout = w.shape
        din_p, dout_p = _round_up(din, LANE), _round_up(dout, LANE)
        w_p = jnp.zeros((din_p, dout_p), jnp.float32).at[:din, :dout].set(w)
        b_p = jnp.zeros((1, dout_p), jnp.float32).at[:, :dout].set(b)
        out.append((w_p.astype(jnp.bfloat16), b_p))
    return out


# ----------------------------------------------------------------------------
# Forward pass
# ----------------------------------------------------------------------------
@jax.jit
def mlp_forward(x, params):
    n, d_in = x.shape
    n_layers = len(params["lins"])
    d_out = params["lins"][-1][0].shape[1]

    wb = _prepare_params(params, apply_bn=(n > 1))
    d_in_pad = wb[0][0].shape[0]
    d_out_pad = wb[-1][0].shape[1]

    # Row tiling: largest convenient tile; sized well under the default scoped
    # VMEM budget on every generation (double-buffered x/out tiles + weights
    # total << 16 MiB even at 512 rows x 128 lanes).
    tile_n = 512
    n_pad16 = _round_up(n, SUBLANE_BF16)
    if n_pad16 < tile_n:
        tile_n = n_pad16
    n_pad = _round_up(n, tile_n)

    # Pad rows + features once in the wrapper (zero padding is exact: padded
    # weight rows/cols are zero so padded lanes stay zero through every layer).
    x_p = jnp.zeros((n_pad, d_in_pad), jnp.float32).at[:n, :d_in].set(x)
    x_p = x_p.astype(jnp.bfloat16)

    in_specs = [pl.BlockSpec((tile_n, d_in_pad), lambda i: (i, 0))]
    flat_inputs = [x_p]
    for w, b in wb:
        in_specs.append(pl.BlockSpec(w.shape, lambda i: (0, 0)))   # resident
        in_specs.append(pl.BlockSpec(b.shape, lambda i: (0, 0)))   # resident
        flat_inputs.append(w)
        flat_inputs.append(b)

    out_p = pl.pallas_call(
        _make_fused_mlp_kernel(n_layers),
        out_shape=jax.ShapeDtypeStruct((n_pad, d_out_pad), jnp.float32),
        grid=(n_pad // tile_n,),
        in_specs=in_specs,
        out_specs=pl.BlockSpec((tile_n, d_out_pad), lambda i: (i, 0)),
        compiler_params=pltpu.CompilerParams(
            dimension_semantics=("parallel",)),   # shard row tiles across TCs (v7x)
    )(*flat_inputs)

    return out_p[:n, :d_out]


# ----------------------------------------------------------------------------
# Pure-JAX reference (eval-mode module math, f32) for a correctness check.
# ----------------------------------------------------------------------------
def mlp_forward_reference(x, params):
    n = x.shape[0]
    n_layers = len(params["lins"])
    h = x
    for i in range(n_layers - 1):
        w, b = params["lins"][i]
        h = jnp.maximum(h @ w + b, 0.0)
        if n > 1:
            gamma, beta, mean, var = params["bns"][i]
            h = (h - mean) * jax.lax.rsqrt(var + _BN_EPS) * gamma + beta
    w, b = params["lins"][-1]
    return h @ w + b


# ----------------------------------------------------------------------------
# Deterministic synthetic parameters mirroring the PyTorch module shapes.
# ----------------------------------------------------------------------------
def init_mlp_params(key, in_channels, hidden_channels, out_channels, n_layers):
    if n_layers == 1:
        dims = [(in_channels, out_channels)]
    else:
        dims = [(in_channels, hidden_channels)]
        dims += [(hidden_channels, hidden_channels)] * (n_layers - 2)
        dims += [(hidden_channels, out_channels)]

    params = {"lins": [], "bns": []}
    for li, (din, dout) in enumerate(dims):
        key, kw, kb = jax.random.split(key, 3)
        w = jax.random.normal(kw, (din, dout), jnp.float32) * 0.1  # [in, out] (= W^T)
        b = jax.random.normal(kb, (1, dout), jnp.float32) * 0.1
        params["lins"].append((w, b))
        if li < len(dims) - 1:  # BN applied only on hidden layers in forward()
            key, kg, kbe, km, kv = jax.random.split(key, 5)
            gamma = 1.0 + 0.1 * jax.random.normal(kg, (1, dout), jnp.float32)
            beta = 0.1 * jax.random.normal(kbe, (1, dout), jnp.float32)
            run_mean = 0.1 * jax.random.normal(km, (1, dout), jnp.float32)
            run_var = jnp.abs(jax.random.normal(kv, (1, dout), jnp.float32)) + 0.5
            params["bns"].append((gamma, beta, run_mean, run_var))
    return params


# ----------------------------------------------------------------------------
if __name__ == "__main__":
    N, IN, HID, OUT, NLAYERS = 64, 16, 32, 8, 3

    key = jax.random.PRNGKey(0)
    key, kx = jax.random.split(key)
    x = jax.random.normal(kx, (N, IN), jnp.float32)
    params = init_mlp_params(key, IN, HID, OUT, NLAYERS)

    out = mlp_forward(x, params)
    jax.block_until_ready(out)
    assert out.shape == (N, OUT), out.shape

    ref = mlp_forward_reference(x, params)
    max_err = float(jnp.max(jnp.abs(out - ref)))
    assert max_err < 2e-2, f"max abs error {max_err}"

    print("KERNEL_OK")
</pallas_src>

<mosaic_0001>
module attributes {stable_mosaic.version = 11 : i64} {
  func.func @kernel(%arg0: i32, %arg1: memref<64x128xbf16, #tpu.memory_space<vmem>>, %arg2: memref<128x128xbf16, #tpu.memory_space<vmem>>, %arg3: memref<1x128xf32, #tpu.memory_space<vmem>>, %arg4: memref<128x128xbf16, #tpu.memory_space<vmem>>, %arg5: memref<1x128xf32, #tpu.memory_space<vmem>>, %arg6: memref<128x128xbf16, #tpu.memory_space<vmem>>, %arg7: memref<1x128xf32, #tpu.memory_space<vmem>>, %arg8: memref<64x128xf32, #tpu.memory_space<vmem>>) attributes {dimension_semantics = [#tpu.dimension_semantics<parallel>], iteration_bounds = array<i64: 1>, scalar_prefetch = 0 : i64, scratch_operands = 0 : i64, tpu.core_type = #tpu.core_type<tc>, window_params = [{transform_indices = @transform_0, window_bounds = array<i64: 64, 128>}, {pipeline_mode = #tpu.pipeline_mode<synchronous>, transform_indices = @transform_1, window_bounds = array<i64: 128, 128>}, {pipeline_mode = #tpu.pipeline_mode<synchronous>, transform_indices = @transform_2, window_bounds = array<i64: 1, 128>}, {pipeline_mode = #tpu.pipeline_mode<synchronous>, transform_indices = @transform_3, window_bounds = array<i64: 128, 128>}, {pipeline_mode = #tpu.pipeline_mode<synchronous>, transform_indices = @transform_4, window_bounds = array<i64: 1, 128>}, {pipeline_mode = #tpu.pipeline_mode<synchronous>, transform_indices = @transform_5, window_bounds = array<i64: 128, 128>}, {pipeline_mode = #tpu.pipeline_mode<synchronous>, transform_indices = @transform_6, window_bounds = array<i64: 1, 128>}, {transform_indices = @transform_7, window_bounds = array<i64: 64, 128>}]} {
    %c0 = arith.constant 0 : index
    %c0_0 = arith.constant 0 : index
    %0 = vector.load %arg1[%c0, %c0_0] : memref<64x128xbf16, #tpu.memory_space<vmem>>, vector<64x128xbf16>
    %c0_1 = arith.constant 0 : index
    %c0_2 = arith.constant 0 : index
    %1 = vector.load %arg2[%c0_1, %c0_2] : memref<128x128xbf16, #tpu.memory_space<vmem>>, vector<128x128xbf16>
    %c0_3 = arith.constant 0 : index
    %c0_4 = arith.constant 0 : index
    %2 = vector.load %arg3[%c0_3, %c0_4] : memref<1x128xf32, #tpu.memory_space<vmem>>, vector<1x128xf32>
    %cst = arith.constant dense<0.000000e+00> : vector<64x128xf32>
    %3 = tpu.matmul %0, %1, %cst {dimension_numbers = #tpu.dot_dimension_numbers<[1], [0], [0], [1], [0, 0, 1, 1], [], []>} : vector<64x128xbf16>, vector<128x128xbf16>, vector<64x128xf32> -> vector<64x128xf32>
    %4 = vector.broadcast %2 : vector<1x128xf32> to vector<64x128xf32>
    %5 = arith.addf %3, %4 : vector<64x128xf32>
    %cst_5 = arith.constant 0.000000e+00 : f32
    %6 = vector.broadcast %cst_5 : f32 to vector<64x128xf32>
    %7 = arith.maximumf %5, %6 : vector<64x128xf32>
    %8 = arith.truncf %7 : vector<64x128xf32> to vector<64x128xbf16>
    %c0_6 = arith.constant 0 : index
    %c0_7 = arith.constant 0 : index
    %9 = vector.load %arg4[%c0_6, %c0_7] : memref<128x128xbf16, #tpu.memory_space<vmem>>, vector<128x128xbf16>
    %c0_8 = arith.constant 0 : index
    %c0_9 = arith.constant 0 : index
    %10 = vector.load %arg5[%c0_8, %c0_9] : memref<1x128xf32, #tpu.memory_space<vmem>>, vector<1x128xf32>
    %cst_10 = arith.constant dense<0.000000e+00> : vector<64x128xf32>
    %11 = tpu.matmul %8, %9, %cst_10 {dimension_numbers = #tpu.dot_dimension_numbers<[1], [0], [0], [1], [0, 0, 1, 1], [], []>} : vector<64x128xbf16>, vector<128x128xbf16>, vector<64x128xf32> -> vector<64x128xf32>
    %12 = vector.broadcast %10 : vector<1x128xf32> to vector<64x128xf32>
    %13 = arith.addf %11, %12 : vector<64x128xf32>
    %cst_11 = arith.constant 0.000000e+00 : f32
    %14 = vector.broadcast %cst_11 : f32 to vector<64x128xf32>
    %15 = arith.maximumf %13, %14 : vector<64x128xf32>
    %16 = arith.truncf %15 : vector<64x128xf32> to vector<64x128xbf16>
    %c0_12 = arith.constant 0 : index
    %c0_13 = arith.constant 0 : index
    %17 = vector.load %arg6[%c0_12, %c0_13] : memref<128x128xbf16, #tpu.memory_space<vmem>>, vector<128x128xbf16>
    %c0_14 = arith.constant 0 : index
    %c0_15 = arith.constant 0 : index
    %18 = vector.load %arg7[%c0_14, %c0_15] : memref<1x128xf32, #tpu.memory_space<vmem>>, vector<1x128xf32>
    %cst_16 = arith.constant dense<0.000000e+00> : vector<64x128xf32>
    %19 = tpu.matmul %16, %17, %cst_16 {dimension_numbers = #tpu.dot_dimension_numbers<[1], [0], [0], [1], [0, 0, 1, 1], [], []>} : vector<64x128xbf16>, vector<128x128xbf16>, vector<64x128xf32> -> vector<64x128xf32>
    %20 = vector.broadcast %18 : vector<1x128xf32> to vector<64x128xf32>
    %21 = arith.addf %19, %20 : vector<64x128xf32>
    %c0_17 = arith.constant 0 : index
    %c0_18 = arith.constant 0 : index
    %22 = vector.load %arg8[%c0_17, %c0_18] : memref<64x128xf32, #tpu.memory_space<vmem>>, vector<64x128xf32>
    tpu.vector_store %arg8[%c0_17, %c0_18], %21 {strides = array<i32>} : memref<64x128xf32, #tpu.memory_space<vmem>>, vector<64x128xf32>,
    return
  }
  func.func @transform_0(%arg0: i32) -> (i32, i32) {
    %c0_i32 = arith.constant 0 : i32
    %c0_i32_0 = arith.constant 0 : i32
    return %arg0, %c0_i32 : i32, i32
  }
  func.func @transform_1(%arg0: i32) -> (i32, i32) {
    %c0_i32 = arith.constant 0 : i32
    %c0_i32_0 = arith.constant 0 : i32
    %c0_i32_1 = arith.constant 0 : i32
    return %c0_i32, %c0_i32_0 : i32, i32
  }
  func.func @transform_2(%arg0: i32) -> (i32, i32) {
    %c0_i32 = arith.constant 0 : i32
    %c0_i32_0 = arith.constant 0 : i32
    %c0_i32_1 = arith.constant 0 : i32
    return %c0_i32, %c0_i32_0 : i32, i32
  }
  func.func @transform_3(%arg0: i32) -> (i32, i32) {
    %c0_i32 = arith.constant 0 : i32
    %c0_i32_0 = arith.constant 0 : i32
    %c0_i32_1 = arith.constant 0 : i32
    return %c0_i32, %c0_i32_0 : i32, i32
  }
  func.func @transform_4(%arg0: i32) -> (i32, i32) {
    %c0_i32 = arith.constant 0 : i32
    %c0_i32_0 = arith.constant 0 : i32
    %c0_i32_1 = arith.constant 0 : i32
    return %c0_i32, %c0_i32_0 : i32, i32
  }
  func.func @transform_5(%arg0: i32) -> (i32, i32) {
    %c0_i32 = arith.constant 0 : i32
    %c0_i32_0 = arith.constant 0 : i32
    %c0_i32_1 = arith.constant 0 : i32
    return %c0_i32, %c0_i32_0 : i32, i32
  }
  func.func @transform_6(%arg0: i32) -> (i32, i32) {
    %c0_i32 = arith.constant 0 : i32
    %c0_i32_0 = arith.constant 0 : i32
    %c0_i32_1 = arith.constant 0 : i32
    return %c0_i32, %c0_i32_0 : i32, i32
  }
  func.func @transform_7(%arg0: i32) -> (i32, i32) {
    %c0_i32 = arith.constant 0 : i32
    %c0_i32_0 = arith.constant 0 : i32
    return %arg0, %c0_i32 : i32, i32
  }
}

</mosaic_0001>

<bundles_post_ra>
// kernel: mlp_forward.1
= control target key start
LH: loop header
LB: loop body
LE: loop exit
PB: predicated region body
PF: predicated region fallthrough
CT: control target
= control target key end

     0   :  { %s693_s1 = inlined_call_operand.vmem [shape: bf16[128,128], index: 1, kind: input, shape index: {}]   ;;  %s694_s2 = inlined_call_operand.vmem [shape: f32[1,128], index: 2, kind: input, shape index: {}]   ;;  %s695_s0 = inlined_call_operand.vmem [shape: bf16[64,128], index: 0, kind: input, shape index: {}]   ;;  %s696_s3 = inlined_call_operand.vmem [shape: bf16[128,128], index: 3, kind: input, shape index: {}]   ;;  %s697_s4 = inlined_call_operand.vmem [shape: f32[1,128], index: 4, kind: input, shape index: {}]   ;;  %s698_s5 = inlined_call_operand.vmem [shape: bf16[128,128], index: 5, kind: input, shape index: {}]   ;;  %s699_s6 = inlined_call_operand.vmem [shape: f32[1,128], index: 6, kind: input, shape index: {}]   ;;  %s700_s7 = inlined_call_operand.vmem [shape: f32[64,128], index: 7, kind: output, shape index: {}]  }
   0x1   :  { %v508_v0 = vld [vmem:[%s693_s1 + $0x38] sm:$0xff]  ;;  %v507_v1 = vld [vmem:[%s693_s1 + $0x30] sm:$0xff]  ;;  %v506_v2 = vld [vmem:[%s693_s1 + $0x28] sm:$0xff] }
   0x2   :  { %126 = vmatpush.bf16.msra.mxu0 %v508_v0  ;;  %525 = vmatpush.bf16.msra.mxu3 %v508_v0  ;;  %v505_v3 = vld [vmem:[%s693_s1 + $0x20] sm:$0xff]  ;;  %v504_v4 = vld [vmem:[%s693_s1 + $0x18] sm:$0xff]  ;;  %v503_v5 = vld [vmem:[%s693_s1 + $0x10] sm:$0xff] }
   0x3   :  { %v502_v6 = vld [vmem:[%s693_s1 + $0x8] sm:$0xff]  ;;  %v501_v7 = vld [vmem:[%s693_s1] sm:$0xff]  ;;  %v516_v10 = vld [vmem:[%s696_s3 + $0x38] sm:$0xff] }
   0x4   :  { %v497_v8 = vld [vmem:[%s695_s0] sm:$0xff]  ;;  %v498_v9 = vld [vmem:[%s695_s0 + $0x8] sm:$0xff]  ;;  %235 = vmatpush.bf16.msra.mxu1 %v516_v10  ;;  %v515_v11 = vld [vmem:[%s696_s3 + $0x30] sm:$0xff] }
   0x5   :  { %v514_v12 = vld [vmem:[%s696_s3 + $0x28] sm:$0xff]  ;;  %v513_v13 = vld [vmem:[%s696_s3 + $0x20] sm:$0xff]  ;;  %v499_v14 = vld [vmem:[%s695_s0 + $0x10] sm:$0xff] }
   0x6   :  { %127 = vmatpush.bf16.msra.mxu0 %v507_v1  ;;  %526 = vmatpush.bf16.msra.mxu3 %v507_v1  ;;  %v500_v15 = vld [vmem:[%s695_s0 + $0x18] sm:$0xff]  ;;  %v511_v17 = vld [vmem:[%s696_s3 + $0x10] sm:$0xff]  ;;  %v510_v18 = vld [vmem:[%s696_s3 + $0x8] sm:$0xff] }
   0x7   :  { %v512_v16 = vld [vmem:[%s696_s3 + $0x18] sm:$0xff]  ;;  %v509_v19 = vld [vmem:[%s696_s3] sm:$0xff]  ;;  %v523_v38 = vld [vmem:[%s698_s5 + $0x30] sm:$0xff] }
   0x8   :  { %236 = vmatpush.bf16.msra.mxu1 %v515_v11  ;;  %v533_v21 = vld [vmem:[%s694_s2] ss:$0 sm:$0xff]  ;;  %v524_v37 = vld [vmem:[%s698_s5 + $0x38] sm:$0xff]  ;;  %v522_v41 = vld [vmem:[%s698_s5 + $0x28] sm:$0xff] }
   0x9   :  { %344 = vmatpush.bf16.msra.mxu2 %v524_v37  ;;  %v521_v45 = vld [vmem:[%s698_s5 + $0x20] sm:$0xff]  ;;  %v520_v53 = vld [vmem:[%s698_s5 + $0x18] sm:$0xff]  ;;  %v519_v54 = vld [vmem:[%s698_s5 + $0x10] sm:$0xff] }
   0xa   :  { %128 = vmatpush.bf16.msra.mxu0 %v506_v2  ;;  %527 = vmatpush.bf16.msra.mxu3 %v506_v2  ;;  %v518_v55 = vld [vmem:[%s698_s5 + $0x8] sm:$0xff]  ;;  %v517_v56 = vld [vmem:[%s698_s5] sm:$0xff] }
   0xb   :  { %v534_v58 = vld [vmem:[%s697_s4] ss:$0 sm:$0xff] }
   0xc   :  { %237 = vmatpush.bf16.msra.mxu1 %v514_v12 }
   0xd   :  { %345 = vmatpush.bf16.msra.mxu2 %v523_v38 }
   0xe   :  { %129 = vmatpush.bf16.msra.mxu0 %v505_v3  ;;  %528 = vmatpush.bf16.msra.mxu3 %v505_v3 }
  0x10   :  { %238 = vmatpush.bf16.msra.mxu1 %v513_v13 }
  0x11   :  { %346 = vmatpush.bf16.msra.mxu2 %v522_v41 }
  0x12   :  { %130 = vmatpush.bf16.msra.mxu0 %v504_v4  ;;  %529 = vmatpush.bf16.msra.mxu3 %v504_v4 }
  0x14   :  { %239 = vmatpush.bf16.msra.mxu1 %v512_v16 }
  0x15   :  { %347 = vmatpush.bf16.msra.mxu2 %v521_v45 }
  0x16   :  { %131 = vmatpush.bf16.msra.mxu0 %v503_v5  ;;  %530 = vmatpush.bf16.msra.mxu3 %v503_v5 }
  0x18   :  { %240 = vmatpush.bf16.msra.mxu1 %v511_v17 }
  0x19   :  { %348 = vmatpush.bf16.msra.mxu2 %v520_v53 }
  0x1a   :  { %132 = vmatpush.bf16.msra.mxu0 %v502_v6  ;;  %531 = vmatpush.bf16.msra.mxu3 %v502_v6 }
  0x1c   :  { %241 = vmatpush.bf16.msra.mxu1 %v510_v18 }
  0x1d   :  { %349 = vmatpush.bf16.msra.mxu2 %v519_v54 }
  0x1e   :  { %133 = vmatpush.bf16.msra.mxu0 %v501_v7  ;;  %532 = vmatpush.bf16.msra.mxu3 %v501_v7 }
  0x20   :  { %242 = vmatpush.bf16.msra.mxu1 %v509_v19 }
  0x21   :  { %134 = vmatmul.bf16.vlgmr.msra.gmra.mxu0 %v497_v8  ;;  %139 = vmatmul.bf16.vlgmr.msra.gmra.mxu3 %v498_v9 }
  0x22   :  { %350 = vmatpush.bf16.msra.mxu2 %v518_v55 }
  0x26   :  { %351 = vmatpush.bf16.msra.mxu2 %v517_v56 }
  0x31   :  { %144 = vmatmul.bf16.gmra.mxu3 %v499_v14 }
  0x41   :  { %149 = vmatmul.bf16.gmra.mxu3 %v500_v15 }
  0x9e   :  { %v135_v20 = vpop.f32.mrf.mxu0 }
  0x9f   :  { %v136_v23 = vadd.f32 %v533_v21, %v135_v20 }
  0xa1   :  { %v155_v26 = vmax.f32 %v136_v23, 0.0 }
  0xa4   :  { %v140_v22 = vpop.f32.mrf.mxu3 }
  0xa5   :  { %v141_v30 = vadd.f32 %v533_v21, %v140_v22  ;;  %v535_v22 = vld [vmem:[%s699_s6] ss:$0 sm:$0xff] }
  0xa6   :  { %v137_v24 = vpop.f32.mrf.mxu0 }
  0xa7   :  { %v138_v25 = vadd.f32 %v533_v21, %v137_v24  ;;  %v157_v33 = vmax.f32 %v141_v30, 0.0 }
  0xa9   :  { %v156_v27 = vmax.f32 %v138_v25, 0.0 }
  0xab   :  { %v163_v28 = vpack.c.bf16 %v156_v27, %v155_v26 }
  0xac   :  { %v142_v29 = vpop.f32.mrf.mxu3 }
  0xad   :  { %243 = vmatmul.bf16.vlgmr.msra.gmra.mxu1 %v163_v28  ;;  %v143_v31 = vadd.f32 %v533_v21, %v142_v29 }
  0xaf   :  { %v158_v34 = vmax.f32 %v143_v31, 0.0 }
  0xb1   :  { %v164_v35 = vpack.c.bf16 %v158_v34, %v157_v33 }
  0xb4   :  { %v145_v32 = vpop.f32.mrf.mxu3 }
  0xb5   :  { %v146_v39 = vadd.f32 %v533_v21, %v145_v32 }
  0xb7   :  { %v159_v43 = vmax.f32 %v146_v39, 0.0 }
  0xbc   :  { %v147_v36 = vpop.f32.mrf.mxu3 }
  0xbd   :  { %248 = vmatmul.bf16.gmra.mxu1 %v164_v35  ;;  %v148_v40 = vadd.f32 %v533_v21, %v147_v36 }
  0xbf   :  { %v160_v44 = vmax.f32 %v148_v40, 0.0 }
  0xc1   :  { %v165_v46 = vpack.c.bf16 %v160_v44, %v159_v43 }
  0xc4   :  { %v150_v42 = vpop.f32.mrf.mxu3 }
  0xc5   :  { %v151_v48 = vadd.f32 %v533_v21, %v150_v42 }
  0xc7   :  { %v161_v50 = vmax.f32 %v151_v48, 0.0 }
  0xcc   :  { %v152_v47 = vpop.f32.mrf.mxu3 }
  0xcd   :  { %253 = vmatmul.bf16.gmra.mxu1 %v165_v46  ;;  %v153_v49 = vadd.f32 %v533_v21, %v152_v47 }
  0xcf   :  { %v162_v51 = vmax.f32 %v153_v49, 0.0 }
  0xd1   :  { %v166_v52 = vpack.c.bf16 %v162_v51, %v161_v50 }
  0xdd   :  { %258 = vmatmul.bf16.gmra.mxu1 %v166_v52 }
 0x12a   :  { %v244_v57 = vpop.f32.mrf.mxu1 }
 0x12b   :  { %v245_v59 = vadd.f32 %v534_v58, %v244_v57 }
 0x12d   :  { %v264_v62 = vmax.f32 %v245_v59, 0.0 }
 0x132   :  { %v246_v60 = vpop.f32.mrf.mxu1 }
 0x133   :  { %v247_v61 = vadd.f32 %v534_v58, %v246_v60 }
 0x135   :  { %v265_v63 = vmax.f32 %v247_v61, 0.0 }
 0x137   :  { %v272_v0 = vpack.c.bf16 %v265_v63, %v264_v62 }
 0x139   :  { %352 = vmatmul.bf16.vlgmr.msra.gmra.mxu2 %v272_v0 }
 0x13a   :  { %v249_v1 = vpop.f32.mrf.mxu1 }
 0x13b   :  { %v250_v2 = vadd.f32 %v534_v58, %v249_v1 }
 0x13d   :  { %v266_v5 = vmax.f32 %v250_v2, 0.0 }
 0x142   :  { %v251_v3 = vpop.f32.mrf.mxu1 }
 0x143   :  { %v252_v4 = vadd.f32 %v534_v58, %v251_v3 }
 0x145   :  { %v267_v6 = vmax.f32 %v252_v4, 0.0 }
 0x147   :  { %v273_v7 = vpack.c.bf16 %v267_v6, %v266_v5 }
 0x149   :  { %357 = vmatmul.bf16.gmra.mxu2 %v273_v7 }
 0x14a   :  { %v254_v8 = vpop.f32.mrf.mxu1 }
 0x14b   :  { %v255_v9 = vadd.f32 %v534_v58, %v254_v8 }
 0x14d   :  { %v268_v12 = vmax.f32 %v255_v9, 0.0 }
 0x152   :  { %v256_v10 = vpop.f32.mrf.mxu1 }
 0x153   :  { %v257_v11 = vadd.f32 %v534_v58, %v256_v10 }
 0x155   :  { %v269_v13 = vmax.f32 %v257_v11, 0.0 }
 0x157   :  { %v274_v14 = vpack.c.bf16 %v269_v13, %v268_v12 }
 0x159   :  { %362 = vmatmul.bf16.gmra.mxu2 %v274_v14 }
 0x15a   :  { %v259_v15 = vpop.f32.mrf.mxu1 }
 0x15b   :  { %v260_v16 = vadd.f32 %v534_v58, %v259_v15 }
 0x15d   :  { %v270_v19 = vmax.f32 %v260_v16, 0.0 }
 0x162   :  { %v261_v17 = vpop.f32.mrf.mxu1 }
 0x163   :  { %v262_v18 = vadd.f32 %v534_v58, %v261_v17 }
 0x165   :  { %v271_v20 = vmax.f32 %v262_v18, 0.0 }
 0x167   :  { %v275_v21 = vpack.c.bf16 %v271_v20, %v270_v19 }
 0x169   :  { %367 = vmatmul.bf16.gmra.mxu2 %v275_v21 }
 0x1bc   :  { %v353_v23 = vpop.f32.mrf.mxu2 }
 0x1bd   :  { %v354_v24 = vadd.f32 %v535_v22, %v353_v23 }
 0x1bf   :  { %373 = vst [vmem:[%s700_s7] sm:$0xff] %v354_v24 }
 0x1c4   :  { %v355_v25 = vpop.f32.mrf.mxu2 }
 0x1c5   :  { %v356_v26 = vadd.f32 %v535_v22, %v355_v25 }
 0x1c7   :  { %374 = vst [vmem:[%s700_s7 + $0x8] sm:$0xff] %v356_v26 }
 0x1cc   :  { %v358_v27 = vpop.f32.mrf.mxu2 }
 0x1cd   :  { %v359_v28 = vadd.f32 %v535_v22, %v358_v27 }
 0x1cf   :  { %375 = vst [vmem:[%s700_s7 + $0x10] sm:$0xff] %v359_v28 }
 0x1d4   :  { %v360_v29 = vpop.f32.mrf.mxu2 }
 0x1d5   :  { %v361_v30 = vadd.f32 %v535_v22, %v360_v29 }
 0x1d7   :  { %376 = vst [vmem:[%s700_s7 + $0x18] sm:$0xff] %v361_v30 }
 0x1dc   :  { %v363_v31 = vpop.f32.mrf.mxu2 }
 0x1dd   :  { %v364_v32 = vadd.f32 %v535_v22, %v363_v31 }
 0x1df   :  { %377 = vst [vmem:[%s700_s7 + $0x20] sm:$0xff] %v364_v32 }
 0x1e4   :  { %v365_v33 = vpop.f32.mrf.mxu2 }
 0x1e5   :  { %v366_v34 = vadd.f32 %v535_v22, %v365_v33 }
 0x1e7   :  { %378 = vst [vmem:[%s700_s7 + $0x28] sm:$0xff] %v366_v34 }
 0x1ec   :  { %v368_v35 = vpop.f32.mrf.mxu2 }
 0x1ed   :  { %v369_v36 = vadd.f32 %v535_v22, %v368_v35 }
 0x1ef   :  { %379 = vst [vmem:[%s700_s7 + $0x30] sm:$0xff] %v369_v36 }
 0x1f4   :  { %v370_v37 = vpop.f32.mrf.mxu2 }
 0x1f5   :  { %v371_v38 = vadd.f32 %v535_v22, %v370_v37 }
 0x1f7   :  { %380 = vst [vmem:[%s700_s7 + $0x38] sm:$0xff] %v371_v38 }

</bundles_post_ra>
